<compile_context>
chip_gen: v7x
topology: tpu7x:2x2x1
jax: 0.10.0
libtpu: 0.0.40
codegen_flags: <defaults>
</compile_context>

<pallas_src>
import functools

import jax
import jax.numpy as jnp
from jax.experimental import pallas as pl
from jax.experimental.pallas import tpu as pltpu

_LANE = 128
_SUBLANE = 8


def _round_up(n, m):
    return ((n + m - 1) // m) * m


def _grnn_seq_kernel(x_ref, w_ref, bias_ref, hp0_ref, hg0_ref,
                     hp_seq_ref, hg_seq_ref, hp_state, hg_state):
    # x_ref:    (Bp, Ip)        streamed over the T grid axis
    # w_ref:    (Ip+Hp, Hp)     resident (stacked [Wp^T ; Wg^T])
    # bias_ref: (1, Hp)         resident (bp + bg, pre-folded)
    # hp0/hg0:  (Bp, Hp)        resident (initial state)
    # hp_state/hg_state: VMEM scratch carrying state across grid steps
    t = pl.program_id(0)

    @pl.when(t == 0)
    def _():
        hp_state[...] = hp0_ref[...]
        hg_state[...] = hg0_ref[...]

    x = x_ref[...]
    hp_old = hp_state[...]
    hg_old = hg_state[...]

    # Single stacked matmul: [x | hg] @ [Wp^T ; Wg^T]  (f32 accumulation).
    xin = jnp.concatenate([x, hg_old], axis=-1)                 # (Bp, Ip+Hp)
    pre = jnp.dot(xin, w_ref[...],
                  preferred_element_type=jnp.float32) + bias_ref[...]

    hp_new = jnp.tanh(pre)                                      # nl == tanh
    hg_new = jnp.tanh(jnp.abs(hp_old + 0.5)) + 1.0

    hp_state[...] = hp_new
    hg_state[...] = hg_new
    hp_seq_ref[...] = hp_new
    hg_seq_ref[...] = hg_new


@jax.jit
def grnn_cell_sequence(x_seq, hp0, hg0, Wp, bp, Wg, bg):
    """Run T GRNNCell steps in one fused pallas_call.

    x_seq: (T, B, I); hp0, hg0: (B, H).
    Returns (hp_seq, hg_seq), each of shape (T, B, H).
    """
    T, B, I = x_seq.shape
    H = Wp.shape[0]

    Bp = _round_up(B, _SUBLANE)
    Ip = _round_up(I, _LANE)
    Hp = _round_up(H, _LANE)
    KK = Ip + Hp
    f32 = jnp.float32

    # Weight stacking / bias folding / casts — done ONCE per call, not per step.
    w = jnp.zeros((KK, Hp), f32)
    w = w.at[:I, :H].set(Wp.astype(f32).T)
    w = w.at[Ip:Ip + H, :H].set(Wg.astype(f32).T)
    bias = jnp.zeros((1, Hp), f32).at[0, :H].set((bp + bg).astype(f32))

    x_p = jnp.zeros((T, Bp, Ip), f32).at[:, :B, :I].set(x_seq.astype(f32))
    hp0_p = jnp.zeros((Bp, Hp), f32).at[:B, :H].set(hp0.astype(f32))
    hg0_p = jnp.zeros((Bp, Hp), f32).at[:B, :H].set(hg0.astype(f32))

    hp_seq, hg_seq = pl.pallas_call(
        _grnn_seq_kernel,
        out_shape=(
            jax.ShapeDtypeStruct((T, Bp, Hp), f32),
            jax.ShapeDtypeStruct((T, Bp, Hp), f32),
        ),
        grid_spec=pltpu.PrefetchScalarGridSpec(
            num_scalar_prefetch=0,
            grid=(T,),
            in_specs=[
                pl.BlockSpec((None, Bp, Ip), lambda t: (t, 0, 0)),  # x(t) streamed
                pl.BlockSpec((KK, Hp), lambda t: (0, 0)),           # weights resident
                pl.BlockSpec((1, Hp), lambda t: (0, 0)),            # fused bias resident
                pl.BlockSpec((Bp, Hp), lambda t: (0, 0)),           # hp0 resident
                pl.BlockSpec((Bp, Hp), lambda t: (0, 0)),           # hg0 resident
            ],
            out_specs=(
                pl.BlockSpec((None, Bp, Hp), lambda t: (t, 0, 0)),
                pl.BlockSpec((None, Bp, Hp), lambda t: (t, 0, 0)),
            ),
            scratch_shapes=[
                pltpu.VMEM((Bp, Hp), f32),   # hp state carry
                pltpu.VMEM((Bp, Hp), f32),   # hg state carry
            ],
        ),
        compiler_params=pltpu.CompilerParams(
            dimension_semantics=("arbitrary",)),
    )(x_p, w, bias, hp0_p, hg0_p)

    return hp_seq[:, :B, :H], hg_seq[:, :B, :H]


def grnn_cell_pallas(x, h, Wp, bp, Wg, bg):
    """Single-step API matching the torch module's forward(x, h=None)."""
    H = Wp.shape[0]
    if h is None:
        hp = jnp.zeros((H,), jnp.float32)
        hg = jnp.zeros((H,), jnp.float32)
    else:
        hp, hg = h
    hp_seq, hg_seq = grnn_cell_sequence(
        x[None, None, :], hp[None, :], hg[None, :], Wp, bp, Wg, bg)
    return hp_seq[0, 0], hg_seq[0, 0]


def reference_step(x, hp, hg, Wp, bp, Wg, bg):
    """Pure-JAX reference for one step (x may be (I,) or (B, I))."""
    hp_new = jnp.tanh(x @ Wp.T + bp + hg @ Wg.T + bg)
    hg_new = jnp.tanh(jnp.abs(hp + 0.5)) + 1.0
    return hp_new, hg_new


if __name__ == "__main__":
    input_size = 16
    hidden_size = 32
    T = 8           # sequence length (fused into one kernel call)
    B = 8           # batch of independent cells (fills sublanes)

    key = jax.random.PRNGKey(0)
    k_wp, k_bp, k_wg, k_bg, k_x = jax.random.split(key, 5)

    # torch.rand -> uniform [0, 1); Wg is the user-supplied geometric matrix.
    Wp = jax.random.uniform(k_wp, (hidden_size, input_size), jnp.float32)
    bp = jax.random.uniform(k_bp, (hidden_size,), jnp.float32)
    Wg = jax.random.uniform(k_wg, (hidden_size, hidden_size), jnp.float32)
    bg = jax.random.uniform(k_bg, (hidden_size,), jnp.float32)

    x_seq = jax.random.uniform(k_x, (T, B, input_size), jnp.float32)

    # h=None path: both hidden states start at zero.
    hp0 = jnp.zeros((B, hidden_size), jnp.float32)
    hg0 = jnp.zeros((B, hidden_size), jnp.float32)

    # --- fused-sequence kernel ---
    hp_seq, hg_seq = grnn_cell_sequence(x_seq, hp0, hg0, Wp, bp, Wg, bg)
    jax.block_until_ready((hp_seq, hg_seq))

    # pure-JAX reference recurrence
    hp_r, hg_r = hp0, hg0
    hp_list, hg_list = [], []
    for t in range(T):
        hp_r, hg_r = reference_step(x_seq[t], hp_r, hg_r, Wp, bp, Wg, bg)
        hp_list.append(hp_r)
        hg_list.append(hg_r)
    hp_ref = jnp.stack(hp_list)
    hg_ref = jnp.stack(hg_list)

    assert jnp.allclose(hp_seq, hp_ref, atol=1e-5), "hp sequence mismatch"
    assert jnp.allclose(hg_seq, hg_ref, atol=1e-5), "hg sequence mismatch"

    # --- single-step API (torch forward parity, h=None then h=(hp, hg)) ---
    x0 = x_seq[0, 0]
    hp1, hg1 = grnn_cell_pallas(x0, None, Wp, bp, Wg, bg)
    jax.block_until_ready((hp1, hg1))
    hp1_ref, hg1_ref = reference_step(
        x0, jnp.zeros(hidden_size), jnp.zeros(hidden_size), Wp, bp, Wg, bg)
    assert jnp.allclose(hp1, hp1_ref, atol=1e-5), "single-step hp mismatch"
    assert jnp.allclose(hg1, hg1_ref, atol=1e-5), "single-step hg mismatch"

    hp2, hg2 = grnn_cell_pallas(x0, (hp1, hg1), Wp, bp, Wg, bg)
    jax.block_until_ready((hp2, hg2))
    hp2_ref, hg2_ref = reference_step(x0, hp1_ref, hg1_ref, Wp, bp, Wg, bg)
    assert jnp.allclose(hp2, hp2_ref, atol=1e-5), "second-step hp mismatch"
    assert jnp.allclose(hg2, hg2_ref, atol=1e-5), "second-step hg mismatch"

    print("KERNEL_OK")
</pallas_src>

<mosaic_0001>
module attributes {stable_mosaic.version = 11 : i64} {
  func.func @_grnn_seq_kernel(%arg0: i32, %arg1: memref<1x8x128xf32, #tpu.memory_space<vmem>>, %arg2: memref<256x128xf32, #tpu.memory_space<vmem>>, %arg3: memref<1x128xf32, #tpu.memory_space<vmem>>, %arg4: memref<8x128xf32, #tpu.memory_space<vmem>>, %arg5: memref<8x128xf32, #tpu.memory_space<vmem>>, %arg6: memref<1x8x128xf32, #tpu.memory_space<vmem>>, %arg7: memref<1x8x128xf32, #tpu.memory_space<vmem>>, %arg8: memref<8x128xf32, #tpu.memory_space<vmem>>, %arg9: memref<8x128xf32, #tpu.memory_space<vmem>>) attributes {dimension_semantics = [#tpu.dimension_semantics<arbitrary>], iteration_bounds = array<i64: 8>, scalar_prefetch = 0 : i64, scratch_operands = 2 : i64, tpu.core_type = #tpu.core_type<tc>, window_params = [{transform_indices = @transform_0, window_bounds = array<i64: 1, 8, 128>}, {pipeline_mode = #tpu.pipeline_mode<synchronous>, transform_indices = @transform_1, window_bounds = array<i64: 256, 128>}, {pipeline_mode = #tpu.pipeline_mode<synchronous>, transform_indices = @transform_2, window_bounds = array<i64: 1, 128>}, {pipeline_mode = #tpu.pipeline_mode<synchronous>, transform_indices = @transform_3, window_bounds = array<i64: 8, 128>}, {pipeline_mode = #tpu.pipeline_mode<synchronous>, transform_indices = @transform_4, window_bounds = array<i64: 8, 128>}, {transform_indices = @transform_5, window_bounds = array<i64: 1, 8, 128>}, {transform_indices = @transform_6, window_bounds = array<i64: 1, 8, 128>}]} {
    %c0_i32 = arith.constant 0 : i32
    %0 = arith.cmpi eq, %arg0, %c0_i32 : i32
    %1 = arith.extui %0 : i1 to i32
    %c0_i32_0 = arith.constant 0 : i32
    %2 = arith.cmpi ne, %1, %c0_i32_0 : i32
    scf.if %2 {
      %c0_23 = arith.constant 0 : index
      %c0_24 = arith.constant 0 : index
      %28 = vector.load %arg4[%c0_23, %c0_24] : memref<8x128xf32, #tpu.memory_space<vmem>>, vector<8x128xf32>
      %c0_25 = arith.constant 0 : index
      %c0_26 = arith.constant 0 : index
      %29 = vector.load %arg8[%c0_25, %c0_26] : memref<8x128xf32, #tpu.memory_space<vmem>>, vector<8x128xf32>
      tpu.vector_store %arg8[%c0_25, %c0_26], %28 {strides = array<i32>} : memref<8x128xf32, #tpu.memory_space<vmem>>, vector<8x128xf32>,
      %c0_27 = arith.constant 0 : index
      %c0_28 = arith.constant 0 : index
      %30 = vector.load %arg5[%c0_27, %c0_28] : memref<8x128xf32, #tpu.memory_space<vmem>>, vector<8x128xf32>
      %c0_29 = arith.constant 0 : index
      %c0_30 = arith.constant 0 : index
      %31 = vector.load %arg9[%c0_29, %c0_30] : memref<8x128xf32, #tpu.memory_space<vmem>>, vector<8x128xf32>
      tpu.vector_store %arg9[%c0_29, %c0_30], %30 {strides = array<i32>} : memref<8x128xf32, #tpu.memory_space<vmem>>, vector<8x128xf32>,
    } else {
    }
    %c0 = arith.constant 0 : index
    %c0_1 = arith.constant 0 : index
    %c0_2 = arith.constant 0 : index
    %3 = vector.load %arg1[%c0, %c0_1, %c0_2] : memref<1x8x128xf32, #tpu.memory_space<vmem>>, vector<1x8x128xf32>
    %4 = vector.shape_cast %3 : vector<1x8x128xf32> to vector<8x128xf32>
    %c0_3 = arith.constant 0 : index
    %c0_4 = arith.constant 0 : index
    %5 = vector.load %arg8[%c0_3, %c0_4] : memref<8x128xf32, #tpu.memory_space<vmem>>, vector<8x128xf32>
    %c0_5 = arith.constant 0 : index
    %c0_6 = arith.constant 0 : index
    %6 = vector.load %arg9[%c0_5, %c0_6] : memref<8x128xf32, #tpu.memory_space<vmem>>, vector<8x128xf32>
    %7 = tpu.concatenate %4, %6 in 1 : vector<8x128xf32>, vector<8x128xf32> -> vector<8x256xf32>
    %c0_7 = arith.constant 0 : index
    %c0_8 = arith.constant 0 : index
    %8 = vector.load %arg2[%c0_7, %c0_8] : memref<256x128xf32, #tpu.memory_space<vmem>>, vector<256x128xf32>
    %cst = arith.constant dense<0.000000e+00> : vector<8x128xf32>
    %9 = tpu.matmul %7, %8, %cst {dimension_numbers = #tpu.dot_dimension_numbers<[1], [0], [0], [1], [0, 0, 1, 1], [], []>} : vector<8x256xf32>, vector<256x128xf32>, vector<8x128xf32> -> vector<8x128xf32>
    %c0_9 = arith.constant 0 : index
    %c0_10 = arith.constant 0 : index
    %10 = vector.load %arg3[%c0_9, %c0_10] : memref<1x128xf32, #tpu.memory_space<vmem>>, vector<1x128xf32>
    %11 = vector.broadcast %10 : vector<1x128xf32> to vector<8x128xf32>
    %12 = arith.addf %9, %11 : vector<8x128xf32>
    %13 = math.tanh %12 : vector<8x128xf32>
    %cst_11 = arith.constant 5.000000e-01 : f32
    %14 = vector.broadcast %cst_11 : f32 to vector<8x128xf32>
    %15 = arith.addf %5, %14 : vector<8x128xf32>
    %16 = math.absf %15 : vector<8x128xf32>
    %17 = math.tanh %16 : vector<8x128xf32>
    %cst_12 = arith.constant 1.000000e+00 : f32
    %18 = vector.broadcast %cst_12 : f32 to vector<8x128xf32>
    %19 = arith.addf %17, %18 : vector<8x128xf32>
    %c0_13 = arith.constant 0 : index
    %c0_14 = arith.constant 0 : index
    %20 = vector.load %arg8[%c0_13, %c0_14] : memref<8x128xf32, #tpu.memory_space<vmem>>, vector<8x128xf32>
    tpu.vector_store %arg8[%c0_13, %c0_14], %13 {strides = array<i32>} : memref<8x128xf32, #tpu.memory_space<vmem>>, vector<8x128xf32>,
    %c0_15 = arith.constant 0 : index
    %c0_16 = arith.constant 0 : index
    %21 = vector.load %arg9[%c0_15, %c0_16] : memref<8x128xf32, #tpu.memory_space<vmem>>, vector<8x128xf32>
    tpu.vector_store %arg9[%c0_15, %c0_16], %19 {strides = array<i32>} : memref<8x128xf32, #tpu.memory_space<vmem>>, vector<8x128xf32>,
    %c0_17 = arith.constant 0 : index
    %c0_18 = arith.constant 0 : index
    %c0_19 = arith.constant 0 : index
    %22 = vector.load %arg6[%c0_17, %c0_18, %c0_19] : memref<1x8x128xf32, #tpu.memory_space<vmem>>, vector<1x8x128xf32>
    %23 = vector.shape_cast %22 : vector<1x8x128xf32> to vector<8x128xf32>
    %24 = vector.shape_cast %13 : vector<8x128xf32> to vector<1x8x128xf32>
    tpu.vector_store %arg6[%c0_17, %c0_18, %c0_19], %24 {strides = array<i32>} : memref<1x8x128xf32, #tpu.memory_space<vmem>>, vector<1x8x128xf32>,
    %c0_20 = arith.constant 0 : index
    %c0_21 = arith.constant 0 : index
    %c0_22 = arith.constant 0 : index
    %25 = vector.load %arg7[%c0_20, %c0_21, %c0_22] : memref<1x8x128xf32, #tpu.memory_space<vmem>>, vector<1x8x128xf32>
    %26 = vector.shape_cast %25 : vector<1x8x128xf32> to vector<8x128xf32>
    %27 = vector.shape_cast %19 : vector<8x128xf32> to vector<1x8x128xf32>
    tpu.vector_store %arg7[%c0_20, %c0_21, %c0_22], %27 {strides = array<i32>} : memref<1x8x128xf32, #tpu.memory_space<vmem>>, vector<1x8x128xf32>,
    return
  }
  func.func @transform_0(%arg0: i32) -> (i32, i32, i32) {
    %c0_i32 = arith.constant 0 : i32
    %c0_i32_0 = arith.constant 0 : i32
    %c0_i32_1 = arith.constant 0 : i32
    return %arg0, %c0_i32, %c0_i32_0 : i32, i32, i32
  }
  func.func @transform_1(%arg0: i32) -> (i32, i32) {
    %c0_i32 = arith.constant 0 : i32
    %c0_i32_0 = arith.constant 0 : i32
    %c0_i32_1 = arith.constant 0 : i32
    return %c0_i32, %c0_i32_0 : i32, i32
  }
  func.func @transform_2(%arg0: i32) -> (i32, i32) {
    %c0_i32 = arith.constant 0 : i32
    %c0_i32_0 = arith.constant 0 : i32
    %c0_i32_1 = arith.constant 0 : i32
    return %c0_i32, %c0_i32_0 : i32, i32
  }
  func.func @transform_3(%arg0: i32) -> (i32, i32) {
    %c0_i32 = arith.constant 0 : i32
    %c0_i32_0 = arith.constant 0 : i32
    %c0_i32_1 = arith.constant 0 : i32
    return %c0_i32, %c0_i32_0 : i32, i32
  }
  func.func @transform_4(%arg0: i32) -> (i32, i32) {
    %c0_i32 = arith.constant 0 : i32
    %c0_i32_0 = arith.constant 0 : i32
    %c0_i32_1 = arith.constant 0 : i32
    return %c0_i32, %c0_i32_0 : i32, i32
  }
  func.func @transform_5(%arg0: i32) -> (i32, i32, i32) {
    %c0_i32 = arith.constant 0 : i32
    %c0_i32_0 = arith.constant 0 : i32
    %c0_i32_1 = arith.constant 0 : i32
    return %arg0, %c0_i32, %c0_i32_0 : i32, i32, i32
  }
  func.func @transform_6(%arg0: i32) -> (i32, i32, i32) {
    %c0_i32 = arith.constant 0 : i32
    %c0_i32_0 = arith.constant 0 : i32
    %c0_i32_1 = arith.constant 0 : i32
    return %arg0, %c0_i32, %c0_i32_0 : i32, i32, i32
  }
}

</mosaic_0001>

<bundles_post_ra>
// kernel: grnn_cell_sequence.1
= control target key start
LH: loop header
LB: loop body
LE: loop exit
PB: predicated region body
PF: predicated region fallthrough
CT: control target
= control target key end

     0   :  { %12 = vsyncpa [#allocation5], 0  ;;  %s1021_s0 = inlined_call_operand.vmem [shape: f32[8,8,128], index: 0, kind: input, shape index: {}]   ;;  %s1022_s1 = inlined_call_operand.vmem [shape: f32[256,128], index: 1, kind: input, shape index: {}]   ;;  %s1023_s2 = inlined_call_operand.vmem [shape: f32[1,128], index: 2, kind: input, shape index: {}]   ;;  %s1024_s3 = inlined_call_operand.vmem [shape: f32[8,128], index: 3, kind: input, shape index: {}]   ;;  %s1025_s4 = inlined_call_operand.vmem [shape: f32[8,128], index: 4, kind: input, shape index: {}]   ;;  %s1026_s5 = inlined_call_operand.hbm [shape: f32[8,8,128], index: 5, kind: output, shape index: {0}]   ;;  %s1027_s6 = inlined_call_operand.hbm [shape: f32[8,8,128], index: 6, kind: output, shape index: {1}]  }
   0x1   :  { %14 = vsyncpa [#allocation5 + $0x1], 0 }
   0x2   :  { %15 = vsyncpa [#allocation7], 0 }
   0x3   :  { %17 = vsyncpa [#allocation7 + $0x1], 0  ;;  %s773_s21 = smov 0   ;;  %s775_s22 = smov 0  }
   0x4   :  { %s777_s23 = smov 0   ;;  %s779_s24 = smov 0  }
   0x5 LB: > { %s794_s25 = sadd.s32 4294967295, %s734_s24   ;;  %s510_s26 = sadd.s32 4294967294, %s734_s24   ;;  %s734_s24 = sphi %s779_s24, %s1033_s24   ;;  %s730_s23 = sphi %s777_s23, %s1032_s23   ;;  %s726_s22 = sphi %s775_s22, %s1031_s22   ;;  %s722_s21 = sphi %s773_s21, %s1030_s21  }
   0x6   : > { %s798_s27 = sadd.s32 1, %s734_s24   ;;  %s140_s28 = sadd.s32 1, %s730_s23 }
   0x7   : > { %s137_s29 = ssub.s32 %s734_s24, %s798_s27  ;;  %p150_p0 = scmp.ne.s32.totalorder %s730_s23, %s726_s22 }
   0x8   : > { %p138_p1 = scmp.eq.s32.totalorder %s137_s29, 0  ;;  %p151_p2 = scmp.eq.s32.totalorder %s794_s25, 7 }
   0x9   : > { %p156_p3 = scmp.ne.s32.totalorder %s726_s22, %s722_s21  ;;  %p157_p4 = scmp.eq.s32.totalorder %s510_s26, 7 }
   0xa   : > { %s809_s30 = scalar_select %p138_p1, %s730_s23, %s140_s28  }
   0xb   : > { %p811_p5 = por %p151_p2, %p150_p0  ;;  %p815_p6 = por %p157_p4, %p156_p3 }
   0xc   : > { %p513_p7 = scmp.ge.s32.totalorder %s734_s24, 1  ;;  %p220_p8 = scmp.lt.s32.totalorder %s734_s24, 9 }
   0xe   : > { %p221_p9 = pnand %p513_p7, %p220_p8 }
   0xf   : > { %s822_s9 = sand.u32 (!%p221_p9), 1, %s726_s22   ;;  %p254_p10 = scmp.lt.s32.totalorder (!%p221_p9), %s794_s25, 7 }
  0x10   : > { %224 = sbr.rel (%p221_p9) target bundleno = 308 (0x134), region = 40  ;;  %s514_s10 = sshll.u32 (!%p221_p9), %s822_s9, 3 }
  0x11   : > { %s832_s16 = scalar_lea.vmem (!%p221_p9), [#allocation4], %s514_s10  ;;  %s834_s17 = scalar_lea.vmem (!%p221_p9), [#allocation6], %s514_s10 }
  0x12   : > { %p517_p11 = scmp.ne.s32.totalorder (!%p221_p9), %s794_s25, 0 }
  0x17   : > { %s255_s11 = scalar_select %p254_p10, %s794_s25, 7 }
  0x18   : > { %261 = sbr.rel (%p517_p11) target bundleno = 31 (0x1f), region = 44  ;;  %v262_v0 = vld [vmem:[%s1024_s3] sm:$0xff] (!%p517_p11) }
  0x19   : > { %s516_s12 = sshll.u32 %s255_s11, 3  ;;  %v264_v1 = vld [vmem:[%s1025_s4] sm:$0xff] (!%p517_p11)  ;;  %263 = vst [vmem:[#allocation2] sm:$0xff] (!%p517_p11), %v262_v0 }
  0x1a   : > { %s830_s15 = scalar_lea.vmem %s1021_s0, %s516_s12  ;;  %265 = vst [vmem:[#allocation3] sm:$0xff] (!%p517_p11), %v264_v1 }
  0x1f PF: > { %v285_v2 = vld [vmem:[%s1022_s1 + $0x80] sm:$0xff]  ;;  %v286_v3 = vld [vmem:[%s1022_s1 + $0x88] sm:$0xff]  ;;  %v287_v7 = vld [vmem:[%s1022_s1 + $0x90] sm:$0xff]  ;;  %s521_s20 = sshll.u32 %s794_s25, 7  ;;  %s419_s10 = sshll.u32 %s834_s17, 4  ;;  %s420_s10 = int_to_ptr.vmem [resolvable:$true] %s419_s10 }
  0x20   : > { %v269_v4 = vld [vmem:[%s1022_s1] sm:$0xff]  ;;  %v560_v5 = vpack.c.bf16 %v286_v3, %v285_v2  ;;  %v270_v6 = vld [vmem:[%s1022_s1 + $0x8] sm:$0xff]  ;;  %v288_v8 = vld [vmem:[%s1022_s1 + $0x98] sm:$0xff]  ;;  %s947_s29 = scalar_lea.hbm %s1027_s6, %s521_s20  ;;  %s393_s11 = scalar_lea.sflag [#allocation7], %s822_s9 }
  0x21   : > { %v562_v9 = vpack.c.bf16 %v270_v6, %v269_v4  ;;  %v564_v10 = vpack.c.bf16 %v288_v8, %v287_v7  ;;  %v271_v11 = vld [vmem:[%s1022_s1 + $0x10] sm:$0xff]  ;;  %v272_v12 = vld [vmem:[%s1022_s1 + $0x18] sm:$0xff]  ;;  %v289_v13 = vld [vmem:[%s1022_s1 + $0xa0] sm:$0xff]  ;;  %s640_s12 = scalar_lea.vmem %s420_s10, 128  ;;  %s736_s13 = smov [#allocation6]  }
  0x22   : > { %561 = vmatprep.subr.bf16.mxu0 %v560_v5  ;;  %v290_v14 = vld [vmem:[%s1022_s1 + $0xa8] sm:$0xff]  ;;  %v566_v15 = vpack.c.bf16 %v272_v12, %v271_v11  ;;  %v273_v17 = vld [vmem:[%s1022_s1 + $0x20] sm:$0xff]  ;;  %v291_v19 = vld [vmem:[%s1022_s1 + $0xb0] sm:$0xff]  ;;  %p641_p12 = scmp.ne.s32.totalorder %s420_s10, %s640_s12  ;;  %s644_s14 = sshll.u32 %s736_s13, 4  ;;  %s645_s14 = int_to_ptr.vmem [resolvable:$false] %s644_s14 }
  0x23   : > { %563 = vmatpush3.bf16.msra.mxu0 %v562_v9  ;;  %v568_v16 = vpack.c.bf16 %v290_v14, %v289_v13  ;;  %v274_v18 = vld [vmem:[%s1022_s1 + $0x28] sm:$0xff]  ;;  %v292_v20 = vld [vmem:[%s1022_s1 + $0xb8] sm:$0xff]  ;;  %v275_v23 = vld [vmem:[%s1022_s1 + $0x30] sm:$0xff]  ;;  %p647_p1 = scmp.lt.s32.totalorder %s420_s10, %s645_s14 }
  0x24   : > { %565 = vmatprep.subr.bf16.mxu0 %v564_v10  ;;  %v570_v21 = vpack.c.bf16 %v274_v18, %v273_v17  ;;  %v572_v22 = vpack.c.bf16 %v292_v20, %v291_v19  ;;  %v276_v24 = vld [vmem:[%s1022_s1 + $0x38] sm:$0xff]  ;;  %v293_v25 = vld [vmem:[%s1022_s1 + $0xc0] sm:$0xff]  ;;  %v294_v26 = vld [vmem:[%s1022_s1 + $0xc8] sm:$0xff]  ;;  %p642_p13 = pnand %p641_p12, %p811_p5 }
  0x25   : > { %v267_v27 = vld [vmem:[#allocation2] sm:$0xff]  ;;  %v268_v28 = vld [vmem:[#allocation3] sm:$0xff]  ;;  %v574_v30 = vpack.c.bf16 %v276_v24, %v275_v23  ;;  %v576_v31 = vpack.c.bf16 %v294_v26, %v293_v25  ;;  %v295_v35 = vld [vmem:[%s1022_s1 + $0xd0] sm:$0xff] }
  0x26   : > { %v379_v29 = vadd.f32 0.5, %v267_v27  ;;  %372 = vmatprep.mubr.f32.mxu0 %v268_v28  ;;  %v277_v32 = vld [vmem:[%s1022_s1 + $0x40] sm:$0xff]  ;;  %v278_v33 = vld [vmem:[%s1022_s1 + $0x48] sm:$0xff]  ;;  %v296_v36 = vld [vmem:[%s1022_s1 + $0xd8] sm:$0xff]  ;;  %p643_p0 = pneg %p642_p13 }
  0x27   : > { %567 = vmatpush3.bf16.msra.mxu0 %v566_v15  ;;  %v578_v37 = vpack.c.bf16 %v278_v33, %v277_v32  ;;  %v580_v38 = vpack.c.bf16 %v296_v36, %v295_v35  ;;  %v279_v39 = vld [vmem:[%s1022_s1 + $0x50] sm:$0xff]  ;;  %v280_v40 = vld [vmem:[%s1022_s1 + $0x58] sm:$0xff]  ;;  %v297_v41 = vld [vmem:[%s1022_s1 + $0xe0] sm:$0xff] }
  0x28   : > { %569 = vmatprep.subr.bf16.mxu0 %v568_v16  ;;  %v380_v34 = vand.u32 2147483647, %v379_v29  ;;  %v298_v42 = vld [vmem:[%s1022_s1 + $0xe8] sm:$0xff]  ;;  %v582_v43 = vpack.c.bf16 %v280_v40, %v279_v39  ;;  %v281_v45 = vld [vmem:[%s1022_s1 + $0x60] sm:$0xff]  ;;  %v299_v47 = vld [vmem:[%s1022_s1 + $0xf0] sm:$0xff] }
  0x29   : > { %v584_v44 = vpack.c.bf16 %v298_v42, %v297_v41  ;;  %v282_v46 = vld [vmem:[%s1022_s1 + $0x68] sm:$0xff]  ;;  %v300_v48 = vld [vmem:[%s1022_s1 + $0xf8] sm:$0xff]  ;;  %v283_v52 = vld [vmem:[%s1022_s1 + $0x70] sm:$0xff] }
  0x2a   : > { %636 = vtanh.f32 %v380_v34  ;;  %v586_v49 = vpack.c.bf16 %v282_v46, %v281_v45  ;;  %v588_v51 = vpack.c.bf16 %v300_v48, %v299_v47  ;;  %v284_v53 = vld [vmem:[%s1022_s1 + $0x78] sm:$0xff]  ;;  %v266_v56 = vld [vmem:[%s830_s15] sm:$0xff]  ;;  %s646_s15 = scalar_lea.vmem %s645_s14, 256 }
  0x2b   : > { %571 = vmatpush3.bf16.msra.mxu0 %v570_v21  ;;  %v590_v55 = vpack.c.bf16 %v284_v53, %v283_v52  ;;  %p648_p2 = scmp.lt.s32.totalorder %s646_s15, %s640_s12 }
  0x2c   : > { %573 = vmatprep.subr.bf16.mxu0 %v572_v22 }
  0x2d   : > { %p649_p3 = por %p648_p2, %p647_p1 }
  0x2f   : > { %575 = vmatpush3.bf16.msra.mxu0 %v574_v30  ;;  %p650_p4 = pnand %p649_p3, %p643_p0 }
  0x30   : > { %577 = vmatprep.subr.bf16.mxu0 %v576_v31 }
  0x33   : > { %579 = vmatpush3.bf16.msra.mxu0 %v578_v37 }
  0x34   : > { %581 = vmatprep.subr.bf16.mxu0 %v580_v38  ;;  %v637_v50 = vpop.eup %636 }
  0x35   : > { %v382_v54 = vadd.f32 1.0, %v637_v50 }
  0x37   : > { %583 = vmatpush3.bf16.msra.mxu0 %v582_v43  ;;  %384 = vst [vmem:[#allocation3] sm:$0xff] %v382_v54  ;;  %386 = vst [vmem:[%s834_s17] sm:$0xff] %v382_v54 }
  0x38   : > { %585 = vmatprep.subr.bf16.mxu0 %v584_v44 }
  0x3b   : > { %587 = vmatpush3.bf16.msra.mxu0 %v586_v49 }
  0x3c   : > { %589 = vmatprep.subr.bf16.mxu0 %v588_v51 }
  0x3f   : > { %591 = vmatpush3.bf16.msra.mxu0 %v590_v55 }
  0x42   : > { %373 = vmatmul.mubr.f32.vlgmr.msra.gmra.mrb[0].mxu0 %v266_v56 }
  0x43   : > { %653 = shalt.err (!%p650_p4)
}
  0x44   : > { %s654_s17 = scalar_lea.hbm %s947_s29, 128  ;;  %s658_s26 = scalar_lea.hbm %s1027_s6, 1024 }
  0x45   : > { %p655_p7 = scmp.ne.s32.totalorder %s947_s29, %s654_s17  ;;  %p659_p10 = scmp.lt.u32.totalorder %s947_s29, %s1027_s6 }
  0x46   : > { %p660_p11 = scmp.lt.u32.totalorder %s658_s26, %s654_s17  ;;  %p662_p13 = scmp.lt.u32.totalorder %s654_s17, %s947_s29 }
  0x47   : > { %p656_p8 = pnand %p655_p7, %p811_p5 }
  0x48   : > { %p661_p12 = por %p660_p11, %p659_p10 }
  0x49   : > { %p657_p9 = pneg %p656_p8 }
  0x4a   : > { %p663_p0 = por %p662_p13, %p661_p12 }
  0x4c   : > { %p664_p1 = pnand %p663_p0, %p657_p9 }
  0x4e   : > { %667 = shalt.err (!%p664_p1)
}
  0x4f   : > { %593 = dma.vmem_to_hbm [thread:$0]  (%p811_p5), %s420_s10, 128, %s947_s29, %s393_s11   ;;  %v518_v58 = vld [vmem:[%s1023_s2] ss:$0 sm:$0xff] }
  0x50   : > { %s406_s15 = sshll.u32 %s832_s16, 4  ;;  %s977_s19 = scalar_lea.hbm %s1026_s5, %s521_s20  ;;  %s979_s15 = int_to_ptr.vmem [resolvable:$true] %s406_s15 }
  0x51   : > { %s388_s29 = scalar_lea.sflag [#allocation5], %s822_s9  ;;  %s668_s10 = scalar_lea.vmem %s979_s15, 128 }
  0x52   : > { %p669_p2 = scmp.ne.s32.totalorder %s979_s15, %s668_s10  ;;  %s737_s25 = smov [#allocation4]  }
  0x53   : > { %s672_s11 = sshll.u32 %s737_s25, 4  ;;  %s673_s11 = int_to_ptr.vmem [resolvable:$false] %s672_s11 }
  0x54   : > { %p670_p3 = pnand %p669_p2, %p811_p5  ;;  %s674_s26 = scalar_lea.vmem %s673_s11, 256 }
  0x55   : > { %p675_p7 = scmp.lt.s32.totalorder %s979_s15, %s673_s11  ;;  %p676_p8 = scmp.lt.s32.totalorder %s674_s26, %s668_s10 }
  0x56   : > { %p671_p4 = pneg %p670_p3 }
  0x57   : > { %p677_p9 = por %p676_p8, %p675_p7 }
  0x59   : > { %p678_p10 = pnand %p677_p9, %p671_p4 }
 0x115   : > { %v557_v57 = vpop.f32.mrb[0].mxu0 }
 0x116   : > { %v558_v59 = vpop.f32.mrb[1].mxu0 }
 0x117   : > { %v559_v60 = vadd.f32 %v558_v59, %v557_v57 }
 0x119   : > { %v375_v61 = vadd.f32 %v559_v60, %v518_v58 }
 0x11b   : > { %638 = vtanh.f32 %v375_v61 }
 0x125   : > { %v639_v62 = vpop.eup %638 }
 0x126   : > { %383 = vst [vmem:[#allocation2] sm:$0xff] %v639_v62  ;;  %385 = vst [vmem:[%s832_s16] sm:$0xff] %v639_v62 }
 0x127   : > { %681 = shalt.err (!%p678_p10)
}
 0x128   : > { %s682_s9 = scalar_lea.hbm %s977_s19, 128  ;;  %s686_s28 = scalar_lea.hbm %s1026_s5, 1024 }
 0x129   : > { %p683_p11 = scmp.ne.s32.totalorder %s977_s19, %s682_s9  ;;  %p687_p0 = scmp.lt.u32.totalorder %s977_s19, %s1026_s5 }
 0x12a   : > { %p688_p1 = scmp.lt.u32.totalorder %s686_s28, %s682_s9  ;;  %p690_p3 = scmp.lt.u32.totalorder %s682_s9, %s977_s19 }
 0x12b   : > { %p684_p12 = pnand %p683_p11, %p811_p5 }
 0x12c   : > { %p689_p2 = por %p688_p1, %p687_p0 }
 0x12d   : > { %p685_p13 = pneg %p684_p12 }
 0x12e   : > { %p691_p4 = por %p690_p3, %p689_p2 }
 0x130   : > { %p692_p7 = pnand %p691_p4, %p685_p13 }
 0x132   : > { %695 = shalt.err (!%p692_p7)
}
 0x133   : > { %592 = dma.vmem_to_hbm [thread:$0]  (%p811_p5), %s979_s15, 128, %s977_s19, %s388_s29  }
 0x134 PF: > { %p603_p8 = scmp.ge.s32.totalorder %s734_s24, 2  ;;  %s431_s14 = sand.u32 1, %s722_s21  }
 0x135   : > { %s432_s17 = scalar_lea.sflag [#allocation5], %s431_s14 }
 0x136   : > { %p597_p9 = pnand %p603_p8, %p815_p6 }
 0x138   : > { %713 = dma.done.wait (!%p597_p9), %s432_s17, 128  }
 0x139   : > { %715 = vsyncadd (!%p597_p9), %s432_s17, 4294967168  ;;  %s441_s18 = scalar_lea.sflag [#allocation7], %s431_s14 }
 0x13a   : > { %717 = dma.done.wait (!%p597_p9), %s441_s18, 128  }
 0x13b   : > { %719 = vsyncadd (!%p597_p9), %s441_s18, 4294967168  ;;  %p20_p5 = scmp.ge.s32.totalorder %s798_s27, 10   ;;  %s1030_s21 = smov %s726_s22 }
 0x13c   : > { %s1031_s22 = smov %s730_s23  ;;  %s1032_s23 = smov %s809_s30 }
 0x13d   : > { %s1033_s24 = smov %s798_s27  ;;  %22 = sbr.rel (!%p20_p5) target bundleno = 5 (0x5), region = 96 }
 0x144   :  { %446 = vsyncpa [#allocation5], 1 }
 0x145   :  { %448 = vsyncpa [#allocation5 + $0x1], 1 }
 0x146   :  { %449 = vsyncpa [#allocation7], 1 }
 0x147   :  { %451 = vsyncpa [#allocation7 + $0x1], 1 }

</bundles_post_ra>
